<compile_context>
chip_gen: v6e
topology: v6e:2x2x1
jax: 0.10.0
libtpu: 0.0.40
codegen_flags: <defaults>
</compile_context>

<pallas_src>
import functools

import jax
import jax.numpy as jnp
from jax import lax
from jax.experimental import pallas as pl
from jax.experimental.pallas import tpu as pltpu

LANES = 128


def _apply_pow(y, p):
    # p is a static Python scalar (module attribute), so branch at trace time.
    if p == 1:
        return y
    if float(p).is_integer():
        # Multiply chain on the VPU; numerically correct for the negative
        # values leaky_relu produces (jnp.power would give NaN via exp/log).
        return lax.integer_pow(y, int(p))
    return jnp.power(y, jnp.asarray(p, y.dtype))


def _leaky_relu_pow_kernel(x_ref, o_ref, *, negative_slope, p):
    x = x_ref[...]
    ns = jnp.asarray(negative_slope, x.dtype)  # keep VPU path in input dtype
    y = jnp.where(x >= 0, x, ns * x)
    o_ref[...] = _apply_pow(y, p)


def _leaky_relu_pow_ref(x, p, negative_slope):
    ns = jnp.asarray(negative_slope, x.dtype)
    return _apply_pow(jnp.where(x >= 0, x, ns * x), p)


def _round_up(v, m):
    return ((v + m - 1) // m) * m


def _run_kernel_2d(x2d, p, negative_slope, tile_r):
    rows = x2d.shape[0]
    grid = (pl.cdiv(rows, tile_r),)
    kernel = functools.partial(
        _leaky_relu_pow_kernel, negative_slope=negative_slope, p=p)
    return pl.pallas_call(
        kernel,
        out_shape=jax.ShapeDtypeStruct(x2d.shape, x2d.dtype),
        grid_spec=pltpu.PrefetchScalarGridSpec(
            num_scalar_prefetch=0,
            grid=grid,
            in_specs=[pl.BlockSpec((tile_r, LANES), lambda i: (i, 0))],
            out_specs=pl.BlockSpec((tile_r, LANES), lambda i: (i, 0)),
        ),
        compiler_params=pltpu.CompilerParams(
            dimension_semantics=("parallel",)),
    )(x2d)


def leaky_relu_k(x, p=1, negative_slope=0.2, *,
                 target_block_bytes=2 * 1024 * 1024):
    """Elementwise leaky_relu(x, negative_slope) ** p, same shape/dtype as x."""
    orig_shape = x.shape
    orig_dtype = x.dtype
    n = x.size
    if n == 0:
        return x

    itemsize = jnp.dtype(orig_dtype).itemsize
    # dtype-dependent sublane multiple: f32 -> 8, bf16/f16 -> 16, int8/fp8 -> 32
    sub_mult = {4: 8, 2: 16, 1: 32}.get(itemsize, 8)
    unit = sub_mult * LANES

    x_flat = x.reshape(-1)
    bulk = (n // unit) * unit
    if bulk == 0:
        # Input smaller than one full tile: plain JAX is cheaper than a kernel.
        return _leaky_relu_pow_ref(x, p, negative_slope)

    rows = bulk // LANES

    # ~target_block_bytes per block; with double-buffered input + output this
    # is ~4x in VMEM (8 MiB for the 2 MiB default), safe on v5e/v6e/v7x.
    tile_r = (target_block_bytes // (LANES * itemsize)) // sub_mult * sub_mult
    tile_r = max(sub_mult, tile_r)
    tile_r = min(tile_r, rows)
    # Keep >= 2 grid steps when possible so v7x can shard the 'parallel' axis
    # across its 2 TensorCores (and the pipeline has something to overlap).
    if pl.cdiv(rows, tile_r) < 2 and rows >= 2 * sub_mult:
        tile_r = _round_up(pl.cdiv(rows, 2), sub_mult)

    if bulk == n:
        # Clean path: no padding, no post-slice, no extra HBM round trips.
        x2d = x_flat.reshape(rows, LANES)
        out2d = _run_kernel_2d(x2d, p, negative_slope, tile_r)
        return out2d.reshape(orig_shape)

    # Ragged path: run the kernel on the aligned bulk, handle only the small
    # (< sub_mult*128 element) tail in plain jnp, then recombine.
    x2d = x_flat[:bulk].reshape(rows, LANES)
    out2d = _run_kernel_2d(x2d, p, negative_slope, tile_r)
    tail = _leaky_relu_pow_ref(x_flat[bulk:], p, negative_slope)
    return jnp.concatenate([out2d.reshape(-1), tail]).reshape(orig_shape)


if __name__ == "__main__":
    key = jax.random.PRNGKey(0)
    # NCHW input, as the PyTorch module would receive.
    x = jax.random.normal(key, (2, 4, 16, 16), dtype=jnp.float32)

    # Module defaults: p=1, negative_slope=0.2
    out = leaky_relu_k(x, p=1, negative_slope=0.2)
    out = jax.block_until_ready(out)
    ref = jnp.where(x >= 0, x, 0.2 * x)
    assert out.shape == x.shape and out.dtype == x.dtype
    assert jnp.allclose(out, ref, atol=1e-6), "mismatch vs reference (p=1)"

    # Non-trivial integer exponent (exercises the integer_pow path, which is
    # correct for the negative values leaky_relu produces).
    out2 = jax.block_until_ready(leaky_relu_k(x, p=2, negative_slope=0.2))
    ref2 = jnp.square(jnp.where(x >= 0, x, 0.2 * x))
    assert jnp.allclose(out2, ref2, atol=1e-6), "mismatch vs reference (p=2)"

    print("KERNEL_OK")
</pallas_src>

<mosaic_0001>
module attributes {stable_mosaic.version = 11 : i64} {
  func.func @_leaky_relu_pow_kernel(%arg0: i32, %arg1: memref<8x128xf32, #tpu.memory_space<vmem>>, %arg2: memref<8x128xf32, #tpu.memory_space<vmem>>) attributes {dimension_semantics = [#tpu.dimension_semantics<parallel>], iteration_bounds = array<i64: 2>, scalar_prefetch = 0 : i64, scratch_operands = 0 : i64, tpu.core_type = #tpu.core_type<tc>, window_params = [{transform_indices = @transform_0, window_bounds = array<i64: 8, 128>}, {transform_indices = @transform_1, window_bounds = array<i64: 8, 128>}]} {
    %c0 = arith.constant 0 : index
    %c0_0 = arith.constant 0 : index
    %0 = vector.load %arg1[%c0, %c0_0] : memref<8x128xf32, #tpu.memory_space<vmem>>, vector<8x128xf32>
    %cst = arith.constant 0.000000e+00 : f32
    %1 = vector.broadcast %cst : f32 to vector<8x128xf32>
    %2 = arith.cmpf oge, %0, %1 : vector<8x128xf32>
    %cst_1 = arith.constant 2.000000e-01 : f32
    %3 = vector.broadcast %cst_1 : f32 to vector<8x128xf32>
    %4 = arith.mulf %3, %0 : vector<8x128xf32>
    %5 = arith.select %2, %0, %4 : vector<8x128xi1>, vector<8x128xf32>
    %c0_2 = arith.constant 0 : index
    %c0_3 = arith.constant 0 : index
    %6 = vector.load %arg2[%c0_2, %c0_3] : memref<8x128xf32, #tpu.memory_space<vmem>>, vector<8x128xf32>
    tpu.vector_store %arg2[%c0_2, %c0_3], %5 {strides = array<i32>} : memref<8x128xf32, #tpu.memory_space<vmem>>, vector<8x128xf32>,
    return
  }
  func.func @transform_0(%arg0: i32) -> (i32, i32) {
    %c0_i32 = arith.constant 0 : i32
    %c0_i32_0 = arith.constant 0 : i32
    return %arg0, %c0_i32 : i32, i32
  }
  func.func @transform_1(%arg0: i32) -> (i32, i32) {
    %c0_i32 = arith.constant 0 : i32
    %c0_i32_0 = arith.constant 0 : i32
    return %arg0, %c0_i32 : i32, i32
  }
}

</mosaic_0001>

<bundles_post_ra>
// kernel: tpu_custom_call.1
= control target key start
LH: loop header
LB: loop body
LE: loop exit
PB: predicated region body
PF: predicated region fallthrough
CT: control target
= control target key end

     0   :  { %6 = vsyncpa [#allocation3], 0  ;;  %s532_s0 = inlined_call_operand.hbm [shape: f32[16,128], index: 0, kind: input, shape index: {}]   ;;  %s533_s1 = inlined_call_operand.hbm [shape: f32[16,128], index: 1, kind: output, shape index: {}]  }
   0x1   :  { %8 = vsyncpa [#allocation3 + $0x1], 0 }
   0x2   :  { %9 = vsyncpa [#allocation4], 0 }
   0x3   :  { %11 = vsyncpa [#allocation4 + $0x1], 0  ;;  %s385_s6 = smov 0   ;;  %s387_s7 = smov 0  }
   0x4   :  { %s389_s8 = smov 0   ;;  %s391_s9 = smov 0  }
   0x5 LB: > { %s406_s10 = sadd.s32 4294967295, %s371_s9   ;;  %s221_s11 = sadd.s32 4294967294, %s371_s9   ;;  %s371_s9 = sphi %s391_s9, %s550_s9   ;;  %s367_s8 = sphi %s389_s8, %s549_s8   ;;  %s363_s7 = sphi %s387_s7, %s548_s7   ;;  %s359_s6 = sphi %s385_s6, %s547_s6  }
   0x6   : > { %s410_s12 = sadd.s32 1, %s371_s9   ;;  %s24_s13 = sadd.s32 1, %s367_s8 }
   0x7   : > { %s21_s14 = ssub.s32 %s371_s9, %s410_s12  ;;  %p31_p0 = scmp.ne.s32.totalorder %s367_s8, %s363_s7 }
   0x8   : > { %p22_p1 = scmp.eq.s32.totalorder %s21_s14, 0  ;;  %p32_p2 = scmp.eq.s32.totalorder %s371_s9, 0 }
   0x9   : > { %p37_p3 = scmp.ne.s32.totalorder %s363_s7, %s359_s6  ;;  %p38_p4 = scmp.eq.s32.totalorder %s406_s10, 0 }
   0xa   : > { %s422_s15 = scalar_select %p22_p1, %s367_s8, %s24_s13  }
   0xb   : > { %p424_p5 = por %p32_p2, %p31_p0  ;;  %p428_p6 = por %p38_p4, %p37_p3 }
   0xc   : > { %p61_p7 = scmp.eq.s32.totalorder %s406_s10, 1  ;;  %p67_p8 = scmp.eq.s32.totalorder %s221_s11, 1 }
   0xd   : > { %s537_s17 = scalar_select %p428_p6, 1, 0 }
   0xe   : > { %p245_p10 = scmp.lt.s32.totalorder %s371_s9, 2  ;;  %p435_p11 = por %p61_p7, %p31_p0 }
   0xf   : > { %p439_p12 = por %p67_p8, %p37_p3  ;;  %s87_s20 = sand.u32 1, %s367_s8  }
  0x10   : > { %s538_s18 = scalar_select %p435_p11, 1, 0 }
  0x11   : > { %s539_s19 = scalar_select %p439_p12, 1, 0 }
  0x12   : > { %s225_s21 = sshll.u32 %s371_s9, 7  ;;  %s224_s22 = sshll.u32 %s87_s20, 3 }
  0x13   : > { %s448_s25 = scalar_lea.hbm %s532_s0, %s225_s21  ;;  %s91_s26 = scalar_lea.vmem [#allocation2], %s224_s22 }
  0x14   : > { %s98_s27 = sshll.u32 %s91_s26, 4  ;;  %p452_p13 = pnand %p245_p10, %p424_p5  ;;  %s456_s27 = int_to_ptr.vmem [resolvable:$true] %s98_s27 }
  0x15   : > { %s88_s29 = scalar_lea.sflag [#allocation3], %s87_s20  ;;  %s279_s30 = scalar_lea.hbm %s448_s25, 128 }
  0x16   : > { %p280_p2 = scmp.ne.s32.totalorder %s448_s25, %s279_s30  ;;  %p281_p3 = pneg %p452_p13 }
  0x17   : > { %s284_s4 = scalar_lea.hbm %s532_s0, 256  ;;  %p285_p5 = scmp.lt.s32.totalorder %s448_s25, %s532_s0 }
  0x18   : > { %p282_p4 = pnand %p281_p3, %p280_p2  ;;  %p286_p8 = scmp.lt.s32.totalorder %s284_s4, %s279_s30 }
  0x1a   : > { %p283_p7 = pneg %p282_p4  ;;  %p287_p10 = por %p286_p8, %p285_p5 }
  0x1c   : > { %p288_p9 = pnand %p287_p10, %p283_p7 }
  0x1e   : > { %291 = shalt.err (!%p288_p9)
}
  0x1f   : > { %s292_s13 = scalar_lea.vmem %s456_s27, 128  ;;  %s373_s14 = smov [#allocation2]  }
  0x20   : > { %p293_p0 = scmp.ne.s32.totalorder %s456_s27, %s292_s13  ;;  %s297_s16 = sshll.u32 %s373_s14, 4  ;;  %s298_s16 = int_to_ptr.vmem [resolvable:$false] %s297_s16 }
  0x21   : > { %s299_s20 = scalar_lea.vmem %s298_s16, 256  ;;  %p300_p4 = scmp.lt.s32.totalorder %s456_s27, %s298_s16 }
  0x22   : > { %p295_p1 = pnand %p293_p0, %p281_p3  ;;  %p301_p12 = scmp.lt.s32.totalorder %s299_s20, %s292_s13 }
  0x24   : > { %p296_p2 = pneg %p295_p1  ;;  %p302_p11 = por %p301_p12, %p300_p4 }
  0x26   : > { %p303_p6 = pnand %p302_p11, %p296_p2 }
  0x28   : > { %306 = shalt.err (!%p303_p6)
}
  0x29   : > { %240 = dma.hbm_to_vmem [thread:$0]  (!%p452_p13), %s448_s25, 128, %s456_s27, %s88_s29  }
  0x2a   : > { %p541_p9 = scmp.lt.s32.totalorder %s371_s9, 3  ;;  %p542_p7 = scmp.ge.s32.totalorder %s371_s9, 1 }
  0x2c   : > { %p104_p0 = pnand %p542_p7, %p541_p9 }
  0x2d   : > { %s483_s21 = sand.u32 (!%p104_p0), 1, %s363_s7   ;;  %p543_p6 = scmp.ne.s32.totalorder (!%p104_p0), %s537_s17, 0 }
  0x2e   : > { %107 = sbr.rel (%p104_p0) target bundleno = 77 (0x4d), region = 24  ;;  %s227_s22 = sshll.u32 (!%p104_p0), %s483_s21, 3 }
  0x2f   : > { %s110_s23 = scalar_lea.sflag (!%p104_p0), [#allocation3], %s483_s21  ;;  %s113_s24 = scalar_lea.vmem (!%p104_p0), [#allocation2], %s227_s22 }
  0x33   : > { %350 = dma.done.wait (%p543_p6), %s110_s23, 128  }
  0x34   : > { %352 = vsyncadd (%p543_p6), %s110_s23, 4294967168  ;;  %s131_s25 = scalar_lea.vmem [#allocation5], %s227_s22  ;;  %s230_s27 = sshll.u32 %s406_s10, 7  ;;  %v132_v0 = vld [vmem:[%s113_s24] sm:$0xff] }
  0x35   : > { %s151_s26 = sshll.u32 %s131_s25, 4  ;;  %vm133_vm0 = vcmp.ge.f32.partialorder %v132_v0, 0.0  ;;  %v134_v1 = vmul.f32 0.2, %v132_v0  ;;  %s149_s30 = scalar_lea.hbm %s533_s1, %s230_s27  ;;  %s492_s26 = int_to_ptr.vmem [resolvable:$true] %s151_s26 }
  0x36   : > { %s138_s17 = scalar_lea.sflag [#allocation4], %s483_s21  ;;  %s307_s2 = scalar_lea.vmem %s492_s26, 128 }
  0x37   : > { %v135_v2 = vsel %vm133_vm0, %v132_v0, %v134_v1  ;;  %p308_p11 = scmp.ne.s32.totalorder %s492_s26, %s307_s2  ;;  %p544_p12 = scmp.ne.s32.totalorder %s538_s18, 0 }
  0x38   : > { %136 = vst [vmem:[%s131_s25] sm:$0xff] %v135_v2  ;;  %s374_s10 = smov [#allocation5]  }
  0x39   : > { %p309_p13 = pnand %p308_p11, %p544_p12  ;;  %s311_s3 = sshll.u32 %s374_s10, 4  ;;  %s312_s3 = int_to_ptr.vmem [resolvable:$false] %s311_s3 }
  0x3a   : > { %s313_s4 = scalar_lea.vmem %s312_s3, 256  ;;  %p314_p3 = scmp.lt.s32.totalorder %s492_s26, %s312_s3 }
  0x3b   : > { %p310_p1 = pneg %p309_p13  ;;  %p315_p5 = scmp.lt.s32.totalorder %s313_s4, %s307_s2 }
  0x3d   : > { %p316_p8 = por %p315_p5, %p314_p3 }
  0x3f   : > { %p317_p10 = pnand %p316_p8, %p310_p1 }
  0x41   : > { %320 = shalt.err (!%p317_p10)
}
  0x42   : > { %s321_s5 = scalar_lea.hbm %s149_s30, 128  ;;  %s325_s14 = scalar_lea.hbm %s533_s1, 256 }
  0x43   : > { %p322_p2 = scmp.ne.s32.totalorder %s149_s30, %s321_s5  ;;  %p326_p7 = scmp.lt.s32.totalorder %s149_s30, %s533_s1 }
  0x44   : > { %p327_p0 = scmp.lt.s32.totalorder %s325_s14, %s321_s5 }
  0x45   : > { %p323_p4 = pnand %p322_p2, %p544_p12 }
  0x46   : > { %p328_p6 = por %p327_p0, %p326_p7 }
  0x47   : > { %p324_p9 = pneg %p323_p4 }
  0x49   : > { %p329_p11 = pnand %p328_p6, %p324_p9 }
  0x4b   : > { %332 = shalt.err (!%p329_p11)
}
  0x4c   : > { %235 = dma.vmem_to_hbm [thread:$0]  (%p544_p12), %s492_s26, 128, %s149_s30, %s138_s17  }
  0x4d PF: > { %s163_s21 = sand.u32 1, %s359_s6   ;;  %p545_p13 = scmp.ne.s32.totalorder %s539_s19, 0 }
  0x4e   : > { %p546_p1 = scmp.ge.s32.totalorder %s371_s9, 2  ;;  %s164_s22 = scalar_lea.sflag [#allocation4], %s163_s21 }
  0x50   : > { %p242_p3 = pnand %p546_p1, %p545_p13 }
  0x52   : > { %p243_p5 = pneg %p242_p3 }
  0x54   : > { %354 = dma.done.wait (%p243_p5), %s164_s22, 128  }
  0x55   : > { %356 = vsyncadd (%p243_p5), %s164_s22, 4294967168  ;;  %p14_p8 = scmp.ge.s32.totalorder %s410_s12, 4   ;;  %s547_s6 = smov %s363_s7 }
  0x56   : > { %s548_s7 = smov %s367_s8  ;;  %s549_s8 = smov %s422_s15 }
  0x57   : > { %s550_s9 = smov %s410_s12  ;;  %16 = sbr.rel (!%p14_p8) target bundleno = 5 (0x5), region = 69 }
  0x5c   :  { %169 = vsyncpa [#allocation3], 1 }
  0x5d   :  { %171 = vsyncpa [#allocation3 + $0x1], 1 }
  0x5e   :  { %172 = vsyncpa [#allocation4], 1 }
  0x5f   :  { %174 = vsyncpa [#allocation4 + $0x1], 1 }

</bundles_post_ra>
